<compile_context>
chip_gen: v6e
topology: v6e:2x2x1
jax: 0.10.0
libtpu: 0.0.40
codegen_flags: <defaults>
</compile_context>

<pallas_src>
import jax
import jax.numpy as jnp
from jax.experimental import pallas as pl
from jax.experimental.pallas import tpu as pltpu

_MAX_TILE = 1024                        # max pixels per lane tile
_VMEM_BLOCK_BUDGET = 20 * 1024 * 1024   # double-buffered in+out block budget (bytes)
_VMEM_LIMIT = 32 * 1024 * 1024          # scoped VMEM limit (safe on v5e/v6e/v7x)


def _fmb_fused_kernel(x_ref, wa_ref, ba_ref, wb_ref, bb_ref, o_ref):
    # x_ref:  (1, Cin, tm)     channels on sublanes, pixels on lanes
    # wa_ref: (4*C1, Cin)      rows ordered (di, dj, c1)   -- layer-1 weight^T
    # ba_ref: (4*C1, 1)
    # wb_ref: (4*C2, C1)       rows ordered (c2, ei, ej)   -- layer-2 weight^T
    # bb_ref: (4*C2, 1)
    # o_ref:  (1, 4, 4*C2, tm) [q = 2*di+dj, r = 4*c2 + 2*ei+ej, pixel]
    x = x_ref[0]                                                     # (Cin, tm)
    h1 = jnp.dot(wa_ref[...], x, preferred_element_type=jnp.float32)
    h1 = jnp.maximum(h1 + ba_ref[...], 0.0)                          # (4*C1, tm)
    c1 = wb_ref.shape[1]
    for q in range(4):                                               # (di, dj) quadrants
        y = h1[q * c1:(q + 1) * c1, :]                               # (C1, tm)
        h2 = jnp.dot(wb_ref[...], y, preferred_element_type=jnp.float32)
        h2 = jnp.maximum(h2 + bb_ref[...], 0.0)                      # (4*C2, tm)
        o_ref[0, q] = h2.astype(o_ref.dtype)


def _choose_pixel_tile(hw, cin, c2):
    """Largest lane tile (multiple of 128 or full HW) fitting the VMEM budget."""
    bytes_per_col = 4 * (cin + 16 * c2) * 2          # f32, double-buffered in+out blocks
    cap = max(128, (_VMEM_BLOCK_BUDGET // bytes_per_col) // 128 * 128)
    max_t = min(_MAX_TILE, cap)
    if hw <= max_t:
        return hw                                    # full pixel axis in one block
    for t in range(max_t, 127, -128):                # prefer an exact divisor of HW
        if hw % t == 0:
            return t
    return max_t                                     # ragged last tile (Pallas masks it)


def fmb_forward(x, w0, b0, w1, b1):
    """FMB_ forward.  x: [N, Cin, H, W] (f32), w0: [Cin, C1, 2, 2], b0: [C1],
    w1: [C1, C2, 2, 2], b1: [C2]  ->  [N, C2, 4H, 4W]."""
    N, Cin, H, W = x.shape
    C1 = w0.shape[1]
    C2 = w1.shape[1]
    HW = H * W

    x3 = x.reshape(N, Cin, HW)                       # pure reshape of NCHW (no copy)

    # Layer-1 weight^T rows = (di, dj, c1) so quadrant q is a contiguous row slice.
    wa = jnp.transpose(w0, (2, 3, 1, 0)).reshape(4 * C1, Cin)
    ba = jnp.tile(b0, 4).reshape(4 * C1, 1)
    # Layer-2 weight^T rows = (c2, ei, ej) so the final reshape is c2-major.
    wb = jnp.transpose(w1, (1, 2, 3, 0)).reshape(4 * C2, C1)
    bb = jnp.repeat(b1, 4).reshape(4 * C2, 1)

    tm = _choose_pixel_tile(HW, Cin, C2)
    grid = (N, pl.cdiv(HW, tm))

    out = pl.pallas_call(
        _fmb_fused_kernel,
        out_shape=jax.ShapeDtypeStruct((N, 4, 4 * C2, HW), jnp.float32),
        grid=grid,
        in_specs=[
            pl.BlockSpec((1, Cin, tm), lambda n, t: (n, 0, t)),
            pl.BlockSpec((4 * C1, Cin), lambda n, t: (0, 0)),
            pl.BlockSpec((4 * C1, 1), lambda n, t: (0, 0)),
            pl.BlockSpec((4 * C2, C1), lambda n, t: (0, 0)),
            pl.BlockSpec((4 * C2, 1), lambda n, t: (0, 0)),
        ],
        out_specs=pl.BlockSpec((1, 4, 4 * C2, tm), lambda n, t: (n, 0, 0, t)),
        compiler_params=pltpu.CompilerParams(
            dimension_semantics=("parallel", "parallel"),
            vmem_limit_bytes=_VMEM_LIMIT,
        ),
    )(x3, wa, ba, wb, bb)

    # Scatter each pixel's 4x4 patch to its spatial slot (single XLA pass):
    # out[n, (di,dj), (c2,ei,ej), (h,w)] -> out_final[n, c2, 4h+2di+ei, 4w+2dj+ej]
    out = out.reshape(N, 2, 2, C2, 2, 2, H, W)           # (n, di, dj, c2, ei, ej, h, w)
    out = out.transpose(0, 3, 6, 1, 4, 7, 2, 5)          # (n, c2, h, di, ei, w, dj, ej)
    return out.reshape(N, C2, 4 * H, 4 * W)


# ---------- pure-JAX reference (correctness check only) ----------
def _ref_deconv2x2_relu_nchw(x, w, b):
    N, C, H, W = x.shape
    Cout = w.shape[1]
    out = jnp.einsum('nchw,coij->nohiwj', x, w)
    out = out.reshape(N, Cout, 2 * H, 2 * W) + b[None, :, None, None]
    return jnp.maximum(out, 0.0)


def _ref_fmb(x, w0, b0, w1, b1):
    h = _ref_deconv2x2_relu_nchw(x, w0, b0)
    return _ref_deconv2x2_relu_nchw(h, w1, b1)


if __name__ == "__main__":
    key = jax.random.PRNGKey(0)
    k_x, k_w0, k_b0, k_w1, k_b1 = jax.random.split(key, 5)

    # Small shapes consistent with the module (inchannels divisible by 4).
    N, Cin, H, W = 2, 8, 16, 16
    C1, C2 = Cin // 2, Cin // 4

    x = jax.random.normal(k_x, (N, Cin, H, W), dtype=jnp.float32)
    # PyTorch ConvTranspose2d weight layout: [in_channels, out_channels, kH, kW]
    w0 = 0.1 * jax.random.normal(k_w0, (Cin, C1, 2, 2), dtype=jnp.float32)
    b0 = 0.1 * jax.random.normal(k_b0, (C1,), dtype=jnp.float32)
    w1 = 0.1 * jax.random.normal(k_w1, (C1, C2, 2, 2), dtype=jnp.float32)
    b1 = 0.1 * jax.random.normal(k_b1, (C2,), dtype=jnp.float32)

    out = jax.block_until_ready(fmb_forward(x, w0, b0, w1, b1))
    assert out.shape == (N, C2, 4 * H, 4 * W), out.shape

    ref = jax.block_until_ready(_ref_fmb(x, w0, b0, w1, b1))
    assert jnp.allclose(out, ref, atol=1e-4, rtol=1e-4), "mismatch vs reference"

    print("KERNEL_OK")
</pallas_src>

<mosaic_0001>
module attributes {stable_mosaic.version = 11 : i64} {
  func.func @_fmb_fused_kernel(%arg0: i32, %arg1: i32, %arg2: memref<1x8x256xf32, #tpu.memory_space<vmem>>, %arg3: memref<16x8xf32, #tpu.memory_space<vmem>>, %arg4: memref<16x1xf32, #tpu.memory_space<vmem>>, %arg5: memref<8x4xf32, #tpu.memory_space<vmem>>, %arg6: memref<8x1xf32, #tpu.memory_space<vmem>>, %arg7: memref<1x4x8x256xf32, #tpu.memory_space<vmem>>) attributes {dimension_semantics = [#tpu.dimension_semantics<parallel>, #tpu.dimension_semantics<parallel>], iteration_bounds = array<i64: 2, 1>, scalar_prefetch = 0 : i64, scratch_operands = 0 : i64, tpu.core_type = #tpu.core_type<tc>, window_params = [{transform_indices = @transform_0, window_bounds = array<i64: 1, 8, 256>}, {pipeline_mode = #tpu.pipeline_mode<synchronous>, transform_indices = @transform_1, window_bounds = array<i64: 16, 8>}, {pipeline_mode = #tpu.pipeline_mode<synchronous>, transform_indices = @transform_2, window_bounds = array<i64: 16, 1>}, {pipeline_mode = #tpu.pipeline_mode<synchronous>, transform_indices = @transform_3, window_bounds = array<i64: 8, 4>}, {pipeline_mode = #tpu.pipeline_mode<synchronous>, transform_indices = @transform_4, window_bounds = array<i64: 8, 1>}, {transform_indices = @transform_5, window_bounds = array<i64: 1, 4, 8, 256>}]} {
    %c0 = arith.constant 0 : index
    %c0_0 = arith.constant 0 : index
    %c0_1 = arith.constant 0 : index
    %0 = vector.load %arg2[%c0, %c0_0, %c0_1] : memref<1x8x256xf32, #tpu.memory_space<vmem>>, vector<1x8x256xf32>
    %1 = vector.shape_cast %0 : vector<1x8x256xf32> to vector<8x256xf32>
    %c0_2 = arith.constant 0 : index
    %c0_3 = arith.constant 0 : index
    %2 = vector.load %arg3[%c0_2, %c0_3] : memref<16x8xf32, #tpu.memory_space<vmem>>, vector<16x8xf32>
    %cst = arith.constant dense<0.000000e+00> : vector<16x256xf32>
    %3 = tpu.matmul %2, %1, %cst {dimension_numbers = #tpu.dot_dimension_numbers<[1], [0], [0], [1], [0, 0, 1, 1], [], []>} : vector<16x8xf32>, vector<8x256xf32>, vector<16x256xf32> -> vector<16x256xf32>
    %c0_4 = arith.constant 0 : index
    %c0_5 = arith.constant 0 : index
    %4 = vector.load %arg4[%c0_4, %c0_5] : memref<16x1xf32, #tpu.memory_space<vmem>>, vector<16x1xf32>
    %5 = vector.broadcast %4 : vector<16x1xf32> to vector<16x256xf32>
    %6 = arith.addf %3, %5 : vector<16x256xf32>
    %cst_6 = arith.constant 0.000000e+00 : f32
    %7 = vector.broadcast %cst_6 : f32 to vector<16x256xf32>
    %8 = arith.maximumf %6, %7 : vector<16x256xf32>
    %9 = vector.extract_strided_slice %8 {offsets = [0, 0], sizes = [4, 256], strides = [1, 1]} : vector<16x256xf32> to vector<4x256xf32>
    %c0_7 = arith.constant 0 : index
    %c0_8 = arith.constant 0 : index
    %10 = vector.load %arg5[%c0_7, %c0_8] : memref<8x4xf32, #tpu.memory_space<vmem>>, vector<8x4xf32>
    %cst_9 = arith.constant dense<0.000000e+00> : vector<8x256xf32>
    %11 = tpu.matmul %10, %9, %cst_9 {dimension_numbers = #tpu.dot_dimension_numbers<[1], [0], [0], [1], [0, 0, 1, 1], [], []>} : vector<8x4xf32>, vector<4x256xf32>, vector<8x256xf32> -> vector<8x256xf32>
    %c0_10 = arith.constant 0 : index
    %c0_11 = arith.constant 0 : index
    %12 = vector.load %arg6[%c0_10, %c0_11] : memref<8x1xf32, #tpu.memory_space<vmem>>, vector<8x1xf32>
    %13 = vector.broadcast %12 : vector<8x1xf32> to vector<8x256xf32>
    %14 = arith.addf %11, %13 : vector<8x256xf32>
    %cst_12 = arith.constant 0.000000e+00 : f32
    %15 = vector.broadcast %cst_12 : f32 to vector<8x256xf32>
    %16 = arith.maximumf %14, %15 : vector<8x256xf32>
    %c0_13 = arith.constant 0 : index
    %c0_14 = arith.constant 0 : index
    %c0_15 = arith.constant 0 : index
    %c0_16 = arith.constant 0 : index
    %17 = vector.load %arg7[%c0_13, %c0_14, %c0_15, %c0_16] : memref<1x4x8x256xf32, #tpu.memory_space<vmem>>, vector<1x1x8x256xf32>
    %18 = vector.shape_cast %17 : vector<1x1x8x256xf32> to vector<8x256xf32>
    %19 = vector.shape_cast %16 : vector<8x256xf32> to vector<1x1x8x256xf32>
    tpu.vector_store %arg7[%c0_13, %c0_14, %c0_15, %c0_16], %19 {strides = array<i32>} : memref<1x4x8x256xf32, #tpu.memory_space<vmem>>, vector<1x1x8x256xf32>,
    %20 = vector.extract_strided_slice %8 {offsets = [4, 0], sizes = [4, 256], strides = [1, 1]} : vector<16x256xf32> to vector<4x256xf32>
    %c0_17 = arith.constant 0 : index
    %c0_18 = arith.constant 0 : index
    %21 = vector.load %arg5[%c0_17, %c0_18] : memref<8x4xf32, #tpu.memory_space<vmem>>, vector<8x4xf32>
    %cst_19 = arith.constant dense<0.000000e+00> : vector<8x256xf32>
    %22 = tpu.matmul %21, %20, %cst_19 {dimension_numbers = #tpu.dot_dimension_numbers<[1], [0], [0], [1], [0, 0, 1, 1], [], []>} : vector<8x4xf32>, vector<4x256xf32>, vector<8x256xf32> -> vector<8x256xf32>
    %c0_20 = arith.constant 0 : index
    %c0_21 = arith.constant 0 : index
    %23 = vector.load %arg6[%c0_20, %c0_21] : memref<8x1xf32, #tpu.memory_space<vmem>>, vector<8x1xf32>
    %24 = vector.broadcast %23 : vector<8x1xf32> to vector<8x256xf32>
    %25 = arith.addf %22, %24 : vector<8x256xf32>
    %cst_22 = arith.constant 0.000000e+00 : f32
    %26 = vector.broadcast %cst_22 : f32 to vector<8x256xf32>
    %27 = arith.maximumf %25, %26 : vector<8x256xf32>
    %c0_23 = arith.constant 0 : index
    %c1 = arith.constant 1 : index
    %c0_24 = arith.constant 0 : index
    %c0_25 = arith.constant 0 : index
    %28 = vector.load %arg7[%c0_23, %c1, %c0_24, %c0_25] : memref<1x4x8x256xf32, #tpu.memory_space<vmem>>, vector<1x1x8x256xf32>
    %29 = vector.shape_cast %28 : vector<1x1x8x256xf32> to vector<8x256xf32>
    %30 = vector.shape_cast %27 : vector<8x256xf32> to vector<1x1x8x256xf32>
    tpu.vector_store %arg7[%c0_23, %c1, %c0_24, %c0_25], %30 {strides = array<i32>} : memref<1x4x8x256xf32, #tpu.memory_space<vmem>>, vector<1x1x8x256xf32>,
    %31 = vector.extract_strided_slice %8 {offsets = [8, 0], sizes = [4, 256], strides = [1, 1]} : vector<16x256xf32> to vector<4x256xf32>
    %c0_26 = arith.constant 0 : index
    %c0_27 = arith.constant 0 : index
    %32 = vector.load %arg5[%c0_26, %c0_27] : memref<8x4xf32, #tpu.memory_space<vmem>>, vector<8x4xf32>
    %cst_28 = arith.constant dense<0.000000e+00> : vector<8x256xf32>
    %33 = tpu.matmul %32, %31, %cst_28 {dimension_numbers = #tpu.dot_dimension_numbers<[1], [0], [0], [1], [0, 0, 1, 1], [], []>} : vector<8x4xf32>, vector<4x256xf32>, vector<8x256xf32> -> vector<8x256xf32>
    %c0_29 = arith.constant 0 : index
    %c0_30 = arith.constant 0 : index
    %34 = vector.load %arg6[%c0_29, %c0_30] : memref<8x1xf32, #tpu.memory_space<vmem>>, vector<8x1xf32>
    %35 = vector.broadcast %34 : vector<8x1xf32> to vector<8x256xf32>
    %36 = arith.addf %33, %35 : vector<8x256xf32>
    %cst_31 = arith.constant 0.000000e+00 : f32
    %37 = vector.broadcast %cst_31 : f32 to vector<8x256xf32>
    %38 = arith.maximumf %36, %37 : vector<8x256xf32>
    %c0_32 = arith.constant 0 : index
    %c2 = arith.constant 2 : index
    %c0_33 = arith.constant 0 : index
    %c0_34 = arith.constant 0 : index
    %39 = vector.load %arg7[%c0_32, %c2, %c0_33, %c0_34] : memref<1x4x8x256xf32, #tpu.memory_space<vmem>>, vector<1x1x8x256xf32>
    %40 = vector.shape_cast %39 : vector<1x1x8x256xf32> to vector<8x256xf32>
    %41 = vector.shape_cast %38 : vector<8x256xf32> to vector<1x1x8x256xf32>
    tpu.vector_store %arg7[%c0_32, %c2, %c0_33, %c0_34], %41 {strides = array<i32>} : memref<1x4x8x256xf32, #tpu.memory_space<vmem>>, vector<1x1x8x256xf32>,
    %42 = vector.extract_strided_slice %8 {offsets = [12, 0], sizes = [4, 256], strides = [1, 1]} : vector<16x256xf32> to vector<4x256xf32>
    %c0_35 = arith.constant 0 : index
    %c0_36 = arith.constant 0 : index
    %43 = vector.load %arg5[%c0_35, %c0_36] : memref<8x4xf32, #tpu.memory_space<vmem>>, vector<8x4xf32>
    %cst_37 = arith.constant dense<0.000000e+00> : vector<8x256xf32>
    %44 = tpu.matmul %43, %42, %cst_37 {dimension_numbers = #tpu.dot_dimension_numbers<[1], [0], [0], [1], [0, 0, 1, 1], [], []>} : vector<8x4xf32>, vector<4x256xf32>, vector<8x256xf32> -> vector<8x256xf32>
    %c0_38 = arith.constant 0 : index
    %c0_39 = arith.constant 0 : index
    %45 = vector.load %arg6[%c0_38, %c0_39] : memref<8x1xf32, #tpu.memory_space<vmem>>, vector<8x1xf32>
    %46 = vector.broadcast %45 : vector<8x1xf32> to vector<8x256xf32>
    %47 = arith.addf %44, %46 : vector<8x256xf32>
    %cst_40 = arith.constant 0.000000e+00 : f32
    %48 = vector.broadcast %cst_40 : f32 to vector<8x256xf32>
    %49 = arith.maximumf %47, %48 : vector<8x256xf32>
    %c0_41 = arith.constant 0 : index
    %c3 = arith.constant 3 : index
    %c0_42 = arith.constant 0 : index
    %c0_43 = arith.constant 0 : index
    %50 = vector.load %arg7[%c0_41, %c3, %c0_42, %c0_43] : memref<1x4x8x256xf32, #tpu.memory_space<vmem>>, vector<1x1x8x256xf32>
    %51 = vector.shape_cast %50 : vector<1x1x8x256xf32> to vector<8x256xf32>
    %52 = vector.shape_cast %49 : vector<8x256xf32> to vector<1x1x8x256xf32>
    tpu.vector_store %arg7[%c0_41, %c3, %c0_42, %c0_43], %52 {strides = array<i32>} : memref<1x4x8x256xf32, #tpu.memory_space<vmem>>, vector<1x1x8x256xf32>,
    return
  }
  func.func @transform_0(%arg0: i32, %arg1: i32) -> (i32, i32, i32) {
    %c0_i32 = arith.constant 0 : i32
    %c0_i32_0 = arith.constant 0 : i32
    return %arg0, %c0_i32, %arg1 : i32, i32, i32
  }
  func.func @transform_1(%arg0: i32, %arg1: i32) -> (i32, i32) {
    %c0_i32 = arith.constant 0 : i32
    %c0_i32_0 = arith.constant 0 : i32
    %c0_i32_1 = arith.constant 0 : i32
    return %c0_i32, %c0_i32_0 : i32, i32
  }
  func.func @transform_2(%arg0: i32, %arg1: i32) -> (i32, i32) {
    %c0_i32 = arith.constant 0 : i32
    %c0_i32_0 = arith.constant 0 : i32
    %c0_i32_1 = arith.constant 0 : i32
    return %c0_i32, %c0_i32_0 : i32, i32
  }
  func.func @transform_3(%arg0: i32, %arg1: i32) -> (i32, i32) {
    %c0_i32 = arith.constant 0 : i32
    %c0_i32_0 = arith.constant 0 : i32
    %c0_i32_1 = arith.constant 0 : i32
    return %c0_i32, %c0_i32_0 : i32, i32
  }
  func.func @transform_4(%arg0: i32, %arg1: i32) -> (i32, i32) {
    %c0_i32 = arith.constant 0 : i32
    %c0_i32_0 = arith.constant 0 : i32
    %c0_i32_1 = arith.constant 0 : i32
    return %c0_i32, %c0_i32_0 : i32, i32
  }
  func.func @transform_5(%arg0: i32, %arg1: i32) -> (i32, i32, i32, i32) {
    %c0_i32 = arith.constant 0 : i32
    %c0_i32_0 = arith.constant 0 : i32
    %c0_i32_1 = arith.constant 0 : i32
    return %arg0, %c0_i32, %c0_i32_0, %arg1 : i32, i32, i32, i32
  }
}

</mosaic_0001>

<bundles_post_ra>
// kernel: tpu_custom_call.1
= control target key start
LH: loop header
LB: loop body
LE: loop exit
PB: predicated region body
PF: predicated region fallthrough
CT: control target
= control target key end

     0   :  { %10 = vsyncpa [#allocation3], 0  ;;  %s1179_s0 = inlined_call_operand.vmem [shape: f32[2,8,256], index: 0, kind: input, shape index: {}]   ;;  %s1180_s1 = inlined_call_operand.vmem [shape: f32[16,8], index: 1, kind: input, shape index: {}]   ;;  %s1181_s2 = inlined_call_operand.vmem [shape: f32[16,1], index: 2, kind: input, shape index: {}]   ;;  %s1182_s3 = inlined_call_operand.vmem [shape: f32[8,4], index: 3, kind: input, shape index: {}]   ;;  %s1183_s4 = inlined_call_operand.vmem [shape: f32[8,1], index: 4, kind: input, shape index: {}]   ;;  %s1184_s5 = inlined_call_operand.hbm [shape: f32[2,4,8,256], index: 5, kind: output, shape index: {}]  }
   0x1   :  { %12 = vsyncpa [#allocation3 + $0x1], 0  ;;  %s1031_s18 = smov 0   ;;  %s1033_s19 = smov 0  }
   0x2   :  { %s1035_s20 = smov 0   ;;  %s1037_s21 = smov 0  }
   0x3   :  { %s1039_s22 = smov 0   ;;  %s1041_s23 = smov 0  }
   0x4 LB: > { %s822_s24 = sadd.s32 4294967295, %s994_s23   ;;  %s823_s25 = sadd.s32 4294967294, %s994_s23   ;;  %s994_s23 = sphi %s1041_s23, %s18_s23   ;;  %s990_s22 = sphi %s1039_s22, %s1191_s22   ;;  %s986_s21 = sphi %s1037_s21, %s1190_s21   ;;  %s982_s20 = sphi %s1035_s20, %s1189_s20   ;;  %s978_s19 = sphi %s1033_s19, %s1188_s19   ;;  %s974_s18 = sphi %s1031_s18, %s1187_s18  }
   0x5   : > { %s30_s26 = sadd.s32 1, %s990_s22  ;;  %s151_s27 = sadd.s32 1, %s982_s20 }
   0x6   : > { %p32_p0 = scmp.ge.s32.totalorder %s30_s26, 2  ;;  %p161_p1 = scmp.ne.s32.totalorder %s982_s20, %s978_s19 }
   0x7   : > { %p162_p2 = scmp.eq.s32.totalorder %s822_s24, 1  ;;  %p167_p3 = scmp.ne.s32.totalorder %s978_s19, %s974_s18 }
   0x8   : > { %s1193_s26 = smov (%p32_p0, %s30_s26), 0  ;;  %p168_p5 = scmp.eq.s32.totalorder %s823_s25, 1 }
   0x9   : > { %p1071_p4 = por %p162_p2, %p161_p1  ;;  %s146_s29 = ssub.s32 %s990_s22, %s1193_s26 }
   0xa   : > { %p826_p6 = scmp.ge.s32.totalorder %s994_s23, 1  ;;  %p149_p7 = scmp.eq.s32.totalorder %s146_s29, 0 }
   0xb   : > { %p1078_p8 = por %p168_p5, %p167_p3  ;;  %p211_p9 = scmp.lt.s32.totalorder %s994_s23, 3 }
   0xc   : > { %s1084_s6 = scalar_select %p149_p7, %s982_s20, %s151_s27  }
   0xd   : > { %p212_p10 = pnand %p826_p6, %p211_p9 }
   0xe   : > { %p244_p11 = scmp.lt.s32.totalorder (!%p212_p10), %s986_s21, 1  ;;  %s856_s12 = sshll.u32 (!%p212_p10), %s986_s21, 10 }
   0xf   : > { %215 = sbr.rel (%p212_p10) target bundleno = 449 (0x1c1), region = 40  ;;  %s1128_s16 = scalar_lea.hbm (!%p212_p10), %s1184_s5, %s856_s12 }
  0x10   : > { %s998_s24 = smov (!%p212_p10), [#allocation2]  }
  0x11   : > { %s922_s25 = sshll.u32 (!%p212_p10), %s998_s24, 4  ;;  %s923_s25 = int_to_ptr.vmem [resolvable:$false] %s922_s25 }
  0x12   : > { %s924_s27 = scalar_lea.vmem (!%p212_p10), %s923_s25, 2048 }
  0x14   : > { %v996_v0 = vmov 0.0   ;;  %v997_v1 = vmov 0   ;;  %v258_v2 = vld [vmem:[%s1181_s2] sm:$0xff]  ;;  %s245_s9 = scalar_select %p244_p11, %s986_s21, 1  ;;  %v259_v3 = vld [vmem:[%s1181_s2 + $0x8] sm:$0xff]  ;;  %vm270_vm0 = vcmask 64512  }
  0x15   : > { %341 = vmatprep.mubr.f32.mxu0 %v996_v0  ;;  %916 = vset.pattern.permute.xlu0 %v997_v1  ;;  %v544_v4 = vld [vmem:[%s1183_s4] sm:$0xff]  ;;  %v257_v8 = vld [vmem:[%s1180_s1 + $0x8] sm:$0xff]  ;;  %vm369_vm1 = vcmask 1043456   ;;  %vm365_vm2 = vcmask 31744  }
  0x16   : > { %262 = vperm.xlu0 %916, %v258_v2   ;;  %440 = vmatprep.mubr.f32.mxu1 %v996_v0  ;;  %s855_s14 = sshll.u32 %s245_s9, 4  ;;  %v256_v7 = vld [vmem:[%s1180_s1] sm:$0xff]  ;;  %s240_s9 = sand.u32 1, %s978_s19  }
  0x17   : > { %917 = vset.pattern.permute.xlu1 %v997_v1  ;;  %s251_s17 = scalar_lea.vmem %s1179_s0, %s855_s14  ;;  %v358_v20 = vld [vmem:[%s1182_s3] sm:$0xff]  ;;  %s827_s10 = sshll.u32 %s240_s9, 6 }
  0x18   : > { %362 = vperm.xlu1 %917, %v544_v4   ;;  %v255_v5 = vld [vmem:[%s251_s17 + $0x8] sm:$0xff]  ;;  %v254_v6 = vld [vmem:[%s251_s17] sm:$0xff]  ;;  %s242_s11 = scalar_lea.vmem [#allocation2], %s827_s10  ;;  %s1134_s21 = scalar_lea.sflag [#allocation3], %s240_s9 }
  0x19   : > { %307 = vmatprep.subr.mxu0 %v255_v5  ;;  %s743_s13 = sshll.u32 %s242_s11, 4  ;;  %s1130_s13 = int_to_ptr.vmem [resolvable:$true] %s743_s13 }
  0x1a   : > { %267 = vperm.xlu0 %916, %v259_v3   ;;  %308 = vmatpush1.msra.mxu0 %v254_v6  ;;  %s918_s17 = scalar_lea.vmem %s1130_s13, 1024  ;;  %p925_p1 = scmp.lt.s32.totalorder %s1130_s13, %s923_s25 }
  0x1b   : > { %830 = vmatmul.mubr.msk.f32.vlgmr.msra.gmra.mxu0 %vm270_vm0, %v256_v7  ;;  %p919_p12 = scmp.ne.s32.totalorder %s1130_s13, %s918_s17  ;;  %p926_p2 = scmp.lt.s32.totalorder %s924_s27, %s918_s17 }
  0x1c   : > { %455 = vperm.xlu1 %917, %v544_v4   ;;  %347 = vmatprep.mubr.f32.mxu0 %v996_v0 }
  0x1d   : > { %p920_p13 = pnand %p919_p12, %p1071_p4  ;;  %p927_p3 = por %p926_p2, %p925_p1 }
  0x1e   : > { %547 = vperm.xlu0 %916, %v544_v4  }
  0x1f   : > { %831 = vmatmul.mubr.msk.f32.gmra.mxu0 %vm270_vm0, %v257_v8  ;;  %p921_p0 = pneg %p920_p13 }
  0x20   : > { %639 = vperm.xlu1 %917, %v544_v4   ;;  %623 = vmatprep.mubr.f32.mxu0 %v996_v0 }
  0x21   : > { %p928_p5 = pnand %p927_p3, %p921_p0 }
  0x91   : > { %v263_v9 = vpop.permute.xlu0 %262 }
  0x93   : > { %v363_v28 = vpop.permute.xlu1 %362 }
  0x95   : > { %v268_v14 = vpop.permute.xlu0 %267 }
  0x97   : > { %v456_v31 = vpop.permute.xlu1 %455 }
  0x99   : > { %v548_v33 = vpop.permute.xlu0 %547 }
  0x9b   : > { %v640_v47 = vpop.permute.xlu1 %639 }
  0xdb   : > { %v343_v10 = vpop.f32.mrf.mxu0 }
  0xdc   : > { %v344_v11 = vadd.f32 %v343_v10, %v263_v9 }
  0xdd   : > { %v345_v12 = vpop.f32.mrf.mxu0 }
  0xde   : > { %v346_v13 = vadd.f32 %v345_v12, %v263_v9  ;;  %v354_v15 = vmax.f32 %v344_v11, 0.0 }
  0xdf   : > { %v349_v16 = vpop.f32.mrf.mxu0 }
  0xe0   : > { %v355_v17 = vmax.f32 %v346_v13, 0.0  ;;  %v350_v18 = vadd.f32 %v349_v16, %v268_v14  ;;  %v458_v23 = vrot.slane %v354_v15, 4 }
  0xe1   : > { %v351_v19 = vpop.f32.mrf.mxu0 }
  0xe2   : > { %v459_v21 = vrot.slane %v355_v17, 4  ;;  %v352_v22 = vadd.f32 %v351_v19, %v268_v14  ;;  %832 = vmatprep.subr.msk.mxu1 %vm369_vm1, %v355_v17  ;;  %v356_v24 = vmax.f32 %v350_v18, 0.0 }
  0xe3   : > { %833 = vmatpush1.msk.msra.mxu1 %vm369_vm1, %v354_v15 }
  0xe4   : > { %v357_v25 = vmax.f32 %v352_v22, 0.0  ;;  %834 = vmatmul.mubr.msk.f32.vlgmr.msra.gmra.mxu1 %vm365_vm2, %v358_v20  ;;  %835 = vmatprep.subr.msk.mxu1 %vm369_vm1, %v459_v21  ;;  %v642_v27 = vrot.slane %v356_v24, 4 }
  0xe5   : > { %836 = vmatpush1.msk.msra.mxu1 %vm369_vm1, %v458_v23  ;;  %531 = vmatprep.mubr.f32.mxu1 %v996_v0 }
  0xe6   : > { %v643_v26 = vrot.slane %v357_v25, 4  ;;  %840 = vmatprep.subr.msk.mxu0 %vm369_vm1, %v357_v25 }
  0xe7   : > { %841 = vmatpush1.msk.msra.mxu0 %vm369_vm1, %v356_v24 }
  0xe8   : > { %837 = vmatmul.mubr.msk.f32.vlgmr.msra.gmra.mxu1 %vm365_vm2, %v358_v20  ;;  %842 = vmatmul.mubr.msk.f32.vlgmr.msra.gmra.mxu0 %vm365_vm2, %v358_v20 }
  0xe9   : > { %845 = vmatprep.subr.msk.mxu1 %vm369_vm1, %v643_v26  ;;  %715 = vmatprep.mubr.f32.mxu1 %v996_v0 }
  0xea   : > { %846 = vmatpush1.msk.msra.mxu1 %vm369_vm1, %v642_v27 }
  0xec   : > { %847 = vmatmul.mubr.msk.f32.vlgmr.msra.gmra.mxu1 %vm365_vm2, %v358_v20 }
 0x1a4   : > { %v442_v29 = vpop.f32.mrf.mxu1 }
 0x1a5   : > { %v443_v30 = vadd.f32 %v442_v29, %v363_v28 }
 0x1a6   : > { %v444_v32 = vpop.f32.mrf.mxu1 }
 0x1a7   : > { %v447_v34 = vmax.f32 %v443_v30, 0.0  ;;  %v445_v35 = vadd.f32 %v444_v32, %v363_v28 }
 0x1a8   : > { %v533_v36 = vpop.f32.mrf.mxu1  ;;  %v625_v37 = vpop.f32.mrf.mxu0 }
 0x1a9   : > { %449 = vst [vmem:[%s242_s11] sm:$0xff] %v447_v34  ;;  %v448_v38 = vmax.f32 %v445_v35, 0.0  ;;  %v534_v39 = vadd.f32 %v533_v36, %v456_v31  ;;  %v626_v40 = vadd.f32 %v625_v37, %v548_v33 }
 0x1aa   : > { %v535_v41 = vpop.f32.mrf.mxu1  ;;  %v627_v42 = vpop.f32.mrf.mxu0 }
 0x1ab   : > { %450 = vst [vmem:[%s242_s11 + $0x8] sm:$0xff] %v448_v38  ;;  %v538_v43 = vmax.f32 %v534_v39, 0.0  ;;  %v630_v44 = vmax.f32 %v626_v40, 0.0  ;;  %v536_v45 = vadd.f32 %v535_v41, %v456_v31  ;;  %v628_v46 = vadd.f32 %v627_v42, %v548_v33 }
 0x1ac   : > { %v717_v48 = vpop.f32.mrf.mxu1 }
 0x1ad   : > { %838 = vst [vmem:[%s242_s11 + $0x10] sm:$0xff] %v538_v43  ;;  %843 = vst [vmem:[%s242_s11 + $0x20] sm:$0xff] %v630_v44  ;;  %v539_v49 = vmax.f32 %v536_v45, 0.0  ;;  %v631_v50 = vmax.f32 %v628_v46, 0.0  ;;  %v718_v51 = vadd.f32 %v717_v48, %v640_v47 }
 0x1ae   : > { %v719_v52 = vpop.f32.mrf.mxu1 }
 0x1af   : > { %839 = vst [vmem:[%s242_s11 + $0x18] sm:$0xff] %v539_v49  ;;  %844 = vst [vmem:[%s242_s11 + $0x28] sm:$0xff] %v631_v50  ;;  %v722_v53 = vmax.f32 %v718_v51, 0.0  ;;  %v720_v54 = vadd.f32 %v719_v52, %v640_v47 }
 0x1b1   : > { %848 = vst [vmem:[%s242_s11 + $0x30] sm:$0xff] %v722_v53  ;;  %v723_v55 = vmax.f32 %v720_v54, 0.0 }
 0x1b3   : > { %849 = vst [vmem:[%s242_s11 + $0x38] sm:$0xff] %v723_v55 }
 0x1b4   : > { %931 = shalt.err (!%p928_p5)
}
 0x1b5   : > { %s932_s29 = scalar_lea.hbm %s1128_s16, 1024  ;;  %s936_s9 = scalar_lea.hbm %s1184_s5, 2048 }
 0x1b6   : > { %p933_p6 = scmp.ne.s32.totalorder %s1128_s16, %s932_s29  ;;  %p937_p10 = scmp.lt.s32.totalorder %s1128_s16, %s1184_s5 }
 0x1b7   : > { %p938_p11 = scmp.lt.s32.totalorder %s936_s9, %s932_s29 }
 0x1b8   : > { %p934_p7 = pnand %p933_p6, %p1071_p4 }
 0x1b9   : > { %p939_p12 = por %p938_p11, %p937_p10 }
 0x1ba   : > { %p935_p9 = pneg %p934_p7 }
 0x1bc   : > { %p940_p13 = pnand %p939_p12, %p935_p9 }
 0x1be   : > { %943 = shalt.err (!%p940_p13)
}
 0x1bf   : > { %s999_s12 = smov 256   ;;  %s1000_s14 = smov 16  }
 0x1c0   : > { %857 = dma.vmem_to_hbm [thread:$0]  (%p1071_p4), %s1130_s13, 1024, %s1128_s16, %s1134_s21, %s999_s12, %s999_s12, %s1000_s14  }
 0x1c1 PF: > { %p863_p0 = scmp.ge.s32.totalorder %s994_s23, 2  ;;  %s758_s15 = sand.u32 1, %s974_s18  }
 0x1c2   : > { %s759_s17 = scalar_lea.sflag [#allocation3], %s758_s15 }
 0x1c3   : > { %p860_p1 = pnand %p863_p0, %p1078_p8 }
 0x1c5   : > { %p861_p2 = pneg %p860_p1 }
 0x1c7   : > { %969 = dma.done.wait (%p861_p2), %s759_s17, 1024  }
 0x1c8   : > { %971 = vsyncadd (%p861_p2), %s759_s17, 4294966272  ;;  %s18_s23 = sadd.s32 1, %s994_s23   ;;  %s1187_s18 = smov %s978_s19 }
 0x1c9   : > { %p15_p3 = scmp.ge.s32.totalorder %s18_s23, 4   ;;  %s1188_s19 = smov %s982_s20 }
 0x1ca   : > { %s1189_s20 = smov %s1084_s6  ;;  %s1190_s21 = smov %s990_s22 }
 0x1cb   : > { %s1191_s22 = smov %s1193_s26  ;;  %17 = sbr.rel (!%p15_p3) target bundleno = 4 (0x4), region = 78 }
 0x1d0   :  { %764 = vsyncpa [#allocation3], 1 }
 0x1d1   :  { %766 = vsyncpa [#allocation3 + $0x1], 1 }

</bundles_post_ra>
